<compile_context>
chip_gen: v5e
topology: v5e:2x2
jax: 0.10.0
libtpu: 0.0.40
codegen_flags: <defaults>
</compile_context>

<pallas_src>
import functools

import jax
import jax.numpy as jnp
from jax.experimental import pallas as pl
from jax.experimental.pallas import tpu as pltpu


def _round_up(x, m):
    return (x + m - 1) // m * m


def _cdiv(a, b):
    return -(-a // b)


def _mlp_kernel(x_ref, w1_ref, b1_ref, w2_ref, b2_ref, w3_ref, b3_ref, o_ref):
    """Fused 3-layer MLP for one batch tile (all operands resident in VMEM).

    Weights arrive in bf16 (pre-cast), biases in f32.  Matmul LHS operands are
    cast to bf16 in-register (VPU, cheap); accumulation / bias / ReLU are f32.
    """
    x = x_ref[...].astype(jnp.bfloat16)

    h1 = jnp.dot(x, w1_ref[...], preferred_element_type=jnp.float32) + b1_ref[...]
    h1 = jnp.maximum(h1, 0.0)

    h2 = (
        jnp.dot(h1.astype(jnp.bfloat16), w2_ref[...], preferred_element_type=jnp.float32)
        + b2_ref[...]
    )
    h2 = jnp.maximum(h2, 0.0)

    out = (
        jnp.dot(h2.astype(jnp.bfloat16), w3_ref[...], preferred_element_type=jnp.float32)
        + b3_ref[...]
    )
    o_ref[...] = out.astype(o_ref.dtype)


def prepare_params(params, compute_dtype=jnp.bfloat16):
    """One-time prep: pad hidden dims to lane-dense 128 multiples and cast
    weights to the MXU compute dtype.  Call once; reuse across forward calls."""
    w1, b1 = params["w1"], params["b1"]
    w2, b2 = params["w2"], params["b2"]
    w3, b3 = params["w3"], params["b3"]
    in_dim, fc1 = w1.shape
    fc2 = w2.shape[1]
    out_dim = w3.shape[1]

    fc1_p = _round_up(fc1, 128)
    fc2_p = _round_up(fc2, 128)

    cd = compute_dtype
    w1p = jnp.zeros((in_dim, fc1_p), cd).at[:, :fc1].set(w1.astype(cd))
    b1p = jnp.zeros((1, fc1_p), jnp.float32).at[0, :fc1].set(b1.astype(jnp.float32))
    w2p = jnp.zeros((fc1_p, fc2_p), cd).at[:fc1, :fc2].set(w2.astype(cd))
    b2p = jnp.zeros((1, fc2_p), jnp.float32).at[0, :fc2].set(b2.astype(jnp.float32))
    # Output dim intentionally NOT padded (see header): only pad the K rows.
    w3p = jnp.zeros((fc2_p, out_dim), cd).at[:fc2, :].set(w3.astype(cd))
    b3p = b3.astype(jnp.float32).reshape(1, out_dim)

    return {"w1": w1p, "b1": b1p, "w2": w2p, "b2": b2p, "w3": w3p, "b3": b3p}


def _pick_block(B, block_b):
    """Batch tile size.

    * B <= 256: single clean step (per-step overhead not worth pipelining).
    * larger B: >=2 grid steps (so v7x can shard the parallel axis over both
      TensorCores), tiles capped at block_b, rounded to 8, snapped to a
      256-multiple (MXU M-dim) only when the extra padded rows stay small.
    """
    B8 = _round_up(B, 8)
    if B8 <= 256:
        return B8
    n_steps = max(2, _cdiv(B8, block_b))
    blk = _round_up(_cdiv(B8, n_steps), 8)
    blk_mxu = _round_up(blk, 256)
    if blk_mxu * n_steps - B8 <= B8 // 16:  # <~6% padded rows
        blk = blk_mxu
    return blk


@functools.partial(jax.jit, static_argnames=("block_b",))
def force_embeddings_forward(x, prepared, block_b=1024):
    """x: (B, input_dim).  prepared: output of prepare_params()."""
    B, in_dim = x.shape
    w1p, b1p = prepared["w1"], prepared["b1"]
    w2p, b2p = prepared["w2"], prepared["b2"]
    w3p, b3p = prepared["w3"], prepared["b3"]
    fc1_p = w1p.shape[1]
    fc2_p = w2p.shape[1]
    out_dim = w3p.shape[1]
    out_dtype = jnp.float32

    # ---- batch tiling --------------------------------------------------------
    blk = _pick_block(B, block_b)
    B_pad = _round_up(B, blk)
    x_p = x if B_pad == B else jnp.pad(x, ((0, B_pad - B), (0, 0)))
    grid = (B_pad // blk,)

    # Weights/biases: full-array blocks, same tile every grid step (resident).
    def full(shape):
        return pl.BlockSpec(shape, lambda i: (0, 0))

    # ---- scheduler hint (real, un-padded output bytes) -----------------------
    flops = 2 * B_pad * (in_dim * fc1_p + fc1_p * fc2_p + fc2_p * out_dim)
    bytes_accessed = (
        B_pad * in_dim * x.dtype.itemsize
        + (w1p.size + w2p.size + w3p.size) * w1p.dtype.itemsize
        + (b1p.size + b2p.size + b3p.size) * 4
        + B_pad * out_dim * 4
    )

    out = pl.pallas_call(
        _mlp_kernel,
        out_shape=jax.ShapeDtypeStruct((B_pad, out_dim), out_dtype),
        grid_spec=pltpu.PrefetchScalarGridSpec(
            num_scalar_prefetch=0,
            grid=grid,
            in_specs=[
                pl.BlockSpec((blk, in_dim), lambda i: (i, 0)),  # x tile
                full((in_dim, fc1_p)),
                full((1, fc1_p)),
                full((fc1_p, fc2_p)),
                full((1, fc2_p)),
                full((fc2_p, out_dim)),
                full((1, out_dim)),
            ],
            out_specs=pl.BlockSpec((blk, out_dim), lambda i: (i, 0)),
        ),
        compiler_params=pltpu.CompilerParams(
            dimension_semantics=("parallel",),
        ),
        cost_estimate=pl.CostEstimate(
            flops=flops, transcendentals=0, bytes_accessed=bytes_accessed
        ),
    )(x_p, w1p, b1p, w2p, b2p, w3p, b3p)

    # Strip batch padding only (output lanes are already exact).
    return out if B_pad == B else out[:B]


def init_params(key, input_dim, output_dim, fc1_size=100, fc2_size=100):
    """Deterministic torch.nn.Linear-style init (uniform +/- 1/sqrt(fan_in))."""
    ks = jax.random.split(key, 6)

    def linear(kw, kb, fan_in, fan_out):
        bound = 1.0 / jnp.sqrt(fan_in)
        # stored as (in, out) for x @ W
        w = jax.random.uniform(kw, (fan_in, fan_out), jnp.float32, -bound, bound)
        b = jax.random.uniform(kb, (fan_out,), jnp.float32, -bound, bound)
        return w, b

    w1, b1 = linear(ks[0], ks[1], input_dim, fc1_size)
    w2, b2 = linear(ks[2], ks[3], fc1_size, fc2_size)
    w3, b3 = linear(ks[4], ks[5], fc2_size, output_dim)
    return {"w1": w1, "b1": b1, "w2": w2, "b2": b2, "w3": w3, "b3": b3}


def reference_forward(x, p, compute_dtype=jnp.float32):
    """Pure-JAX reference; compute_dtype=bfloat16 mirrors the kernel's casts."""
    cd = compute_dtype
    h1 = jnp.maximum(
        jnp.dot(x.astype(cd), p["w1"].astype(cd), preferred_element_type=jnp.float32)
        + p["b1"], 0.0)
    h2 = jnp.maximum(
        jnp.dot(h1.astype(cd), p["w2"].astype(cd), preferred_element_type=jnp.float32)
        + p["b2"], 0.0)
    return (
        jnp.dot(h2.astype(cd), p["w3"].astype(cd), preferred_element_type=jnp.float32)
        + p["b3"])


if __name__ == "__main__":
    key = jax.random.PRNGKey(0)
    k_x, k_x2, k_p = jax.random.split(key, 3)

    input_dim, output_dim = 32, 16
    params = init_params(k_p, input_dim, output_dim, fc1_size=100, fc2_size=100)
    prepared = prepare_params(params)  # hoisted one-time padding + bf16 cast

    # Tiny batch: single grid step, no batch padding.
    B = 8
    x = jax.random.normal(k_x, (B, input_dim), jnp.float32)
    out = jax.block_until_ready(force_embeddings_forward(x, prepared))
    ref_matched = reference_forward(x, params, compute_dtype=jnp.bfloat16)
    ref_f32 = reference_forward(x, params, compute_dtype=jnp.float32)
    assert out.shape == (B, output_dim)
    assert jnp.allclose(out, ref_matched, atol=2e-2, rtol=2e-2)
    assert jnp.allclose(out, ref_f32, atol=5e-2, rtol=5e-2)

    # Larger ragged batch: exercises the 2-step grid (v7x dual-TC path) and the
    # conditional batch-padding path (600 -> blk 304, pad to 608).
    B2 = 600
    x2 = jax.random.normal(k_x2, (B2, input_dim), jnp.float32)
    out2 = jax.block_until_ready(force_embeddings_forward(x2, prepared))
    ref2_matched = reference_forward(x2, params, compute_dtype=jnp.bfloat16)
    ref2_f32 = reference_forward(x2, params, compute_dtype=jnp.float32)
    assert out2.shape == (B2, output_dim)
    assert jnp.allclose(out2, ref2_matched, atol=2e-2, rtol=2e-2)
    assert jnp.allclose(out2, ref2_f32, atol=5e-2, rtol=5e-2)

    print("KERNEL_OK")
</pallas_src>

<mosaic_0001>
module attributes {stable_mosaic.version = 11 : i64} {
  func.func @_mlp_kernel(%arg0: i32, %arg1: memref<8x32xf32, #tpu.memory_space<vmem>>, %arg2: memref<32x128xbf16, #tpu.memory_space<vmem>>, %arg3: memref<1x128xf32, #tpu.memory_space<vmem>>, %arg4: memref<128x128xbf16, #tpu.memory_space<vmem>>, %arg5: memref<1x128xf32, #tpu.memory_space<vmem>>, %arg6: memref<128x16xbf16, #tpu.memory_space<vmem>>, %arg7: memref<1x16xf32, #tpu.memory_space<vmem>>, %arg8: memref<8x16xf32, #tpu.memory_space<vmem>>) attributes {dimension_semantics = [#tpu.dimension_semantics<parallel>], iteration_bounds = array<i64: 1>, scalar_prefetch = 0 : i64, scratch_operands = 0 : i64, tpu.core_type = #tpu.core_type<tc>, window_params = [{transform_indices = @transform_0, window_bounds = array<i64: 8, 32>}, {pipeline_mode = #tpu.pipeline_mode<synchronous>, transform_indices = @transform_1, window_bounds = array<i64: 32, 128>}, {pipeline_mode = #tpu.pipeline_mode<synchronous>, transform_indices = @transform_2, window_bounds = array<i64: 1, 128>}, {pipeline_mode = #tpu.pipeline_mode<synchronous>, transform_indices = @transform_3, window_bounds = array<i64: 128, 128>}, {pipeline_mode = #tpu.pipeline_mode<synchronous>, transform_indices = @transform_4, window_bounds = array<i64: 1, 128>}, {pipeline_mode = #tpu.pipeline_mode<synchronous>, transform_indices = @transform_5, window_bounds = array<i64: 128, 16>}, {pipeline_mode = #tpu.pipeline_mode<synchronous>, transform_indices = @transform_6, window_bounds = array<i64: 1, 16>}, {transform_indices = @transform_7, window_bounds = array<i64: 8, 16>}]} {
    %c0 = arith.constant 0 : index
    %c0_0 = arith.constant 0 : index
    %0 = vector.load %arg1[%c0, %c0_0] : memref<8x32xf32, #tpu.memory_space<vmem>>, vector<8x32xf32>
    %1 = arith.truncf %0 : vector<8x32xf32> to vector<8x32xbf16>
    %c0_1 = arith.constant 0 : index
    %c0_2 = arith.constant 0 : index
    %2 = vector.load %arg2[%c0_1, %c0_2] : memref<32x128xbf16, #tpu.memory_space<vmem>>, vector<32x128xbf16>
    %cst = arith.constant dense<0.000000e+00> : vector<8x128xf32>
    %3 = tpu.matmul %1, %2, %cst {dimension_numbers = #tpu.dot_dimension_numbers<[1], [0], [0], [1], [0, 0, 1, 1], [], []>} : vector<8x32xbf16>, vector<32x128xbf16>, vector<8x128xf32> -> vector<8x128xf32>
    %c0_3 = arith.constant 0 : index
    %c0_4 = arith.constant 0 : index
    %4 = vector.load %arg3[%c0_3, %c0_4] : memref<1x128xf32, #tpu.memory_space<vmem>>, vector<1x128xf32>
    %5 = vector.broadcast %4 : vector<1x128xf32> to vector<8x128xf32>
    %6 = arith.addf %3, %5 : vector<8x128xf32>
    %cst_5 = arith.constant 0.000000e+00 : f32
    %7 = vector.broadcast %cst_5 : f32 to vector<8x128xf32>
    %8 = arith.maximumf %6, %7 : vector<8x128xf32>
    %9 = arith.truncf %8 : vector<8x128xf32> to vector<8x128xbf16>
    %c0_6 = arith.constant 0 : index
    %c0_7 = arith.constant 0 : index
    %10 = vector.load %arg4[%c0_6, %c0_7] : memref<128x128xbf16, #tpu.memory_space<vmem>>, vector<128x128xbf16>
    %cst_8 = arith.constant dense<0.000000e+00> : vector<8x128xf32>
    %11 = tpu.matmul %9, %10, %cst_8 {dimension_numbers = #tpu.dot_dimension_numbers<[1], [0], [0], [1], [0, 0, 1, 1], [], []>} : vector<8x128xbf16>, vector<128x128xbf16>, vector<8x128xf32> -> vector<8x128xf32>
    %c0_9 = arith.constant 0 : index
    %c0_10 = arith.constant 0 : index
    %12 = vector.load %arg5[%c0_9, %c0_10] : memref<1x128xf32, #tpu.memory_space<vmem>>, vector<1x128xf32>
    %13 = vector.broadcast %12 : vector<1x128xf32> to vector<8x128xf32>
    %14 = arith.addf %11, %13 : vector<8x128xf32>
    %cst_11 = arith.constant 0.000000e+00 : f32
    %15 = vector.broadcast %cst_11 : f32 to vector<8x128xf32>
    %16 = arith.maximumf %14, %15 : vector<8x128xf32>
    %17 = arith.truncf %16 : vector<8x128xf32> to vector<8x128xbf16>
    %c0_12 = arith.constant 0 : index
    %c0_13 = arith.constant 0 : index
    %18 = vector.load %arg6[%c0_12, %c0_13] : memref<128x16xbf16, #tpu.memory_space<vmem>>, vector<128x16xbf16>
    %cst_14 = arith.constant dense<0.000000e+00> : vector<8x16xf32>
    %19 = tpu.matmul %17, %18, %cst_14 {dimension_numbers = #tpu.dot_dimension_numbers<[1], [0], [0], [1], [0, 0, 1, 1], [], []>} : vector<8x128xbf16>, vector<128x16xbf16>, vector<8x16xf32> -> vector<8x16xf32>
    %c0_15 = arith.constant 0 : index
    %c0_16 = arith.constant 0 : index
    %20 = vector.load %arg7[%c0_15, %c0_16] : memref<1x16xf32, #tpu.memory_space<vmem>>, vector<1x16xf32>
    %21 = vector.broadcast %20 : vector<1x16xf32> to vector<8x16xf32>
    %22 = arith.addf %19, %21 : vector<8x16xf32>
    %c0_17 = arith.constant 0 : index
    %c0_18 = arith.constant 0 : index
    %23 = vector.load %arg8[%c0_17, %c0_18] : memref<8x16xf32, #tpu.memory_space<vmem>>, vector<8x16xf32>
    tpu.vector_store %arg8[%c0_17, %c0_18], %22 {strides = array<i32>} : memref<8x16xf32, #tpu.memory_space<vmem>>, vector<8x16xf32>,
    return
  }
  func.func @transform_0(%arg0: i32) -> (i32, i32) {
    %c0_i32 = arith.constant 0 : i32
    %c0_i32_0 = arith.constant 0 : i32
    return %arg0, %c0_i32 : i32, i32
  }
  func.func @transform_1(%arg0: i32) -> (i32, i32) {
    %c0_i32 = arith.constant 0 : i32
    %c0_i32_0 = arith.constant 0 : i32
    %c0_i32_1 = arith.constant 0 : i32
    return %c0_i32, %c0_i32_0 : i32, i32
  }
  func.func @transform_2(%arg0: i32) -> (i32, i32) {
    %c0_i32 = arith.constant 0 : i32
    %c0_i32_0 = arith.constant 0 : i32
    %c0_i32_1 = arith.constant 0 : i32
    return %c0_i32, %c0_i32_0 : i32, i32
  }
  func.func @transform_3(%arg0: i32) -> (i32, i32) {
    %c0_i32 = arith.constant 0 : i32
    %c0_i32_0 = arith.constant 0 : i32
    %c0_i32_1 = arith.constant 0 : i32
    return %c0_i32, %c0_i32_0 : i32, i32
  }
  func.func @transform_4(%arg0: i32) -> (i32, i32) {
    %c0_i32 = arith.constant 0 : i32
    %c0_i32_0 = arith.constant 0 : i32
    %c0_i32_1 = arith.constant 0 : i32
    return %c0_i32, %c0_i32_0 : i32, i32
  }
  func.func @transform_5(%arg0: i32) -> (i32, i32) {
    %c0_i32 = arith.constant 0 : i32
    %c0_i32_0 = arith.constant 0 : i32
    %c0_i32_1 = arith.constant 0 : i32
    return %c0_i32, %c0_i32_0 : i32, i32
  }
  func.func @transform_6(%arg0: i32) -> (i32, i32) {
    %c0_i32 = arith.constant 0 : i32
    %c0_i32_0 = arith.constant 0 : i32
    %c0_i32_1 = arith.constant 0 : i32
    return %c0_i32, %c0_i32_0 : i32, i32
  }
  func.func @transform_7(%arg0: i32) -> (i32, i32) {
    %c0_i32 = arith.constant 0 : i32
    %c0_i32_0 = arith.constant 0 : i32
    return %arg0, %c0_i32 : i32, i32
  }
}

</mosaic_0001>

<bundles_post_ra>
// kernel: force_embeddings_forward.1
= control target key start
LH: loop header
LB: loop body
LE: loop exit
PB: predicated region body
PF: predicated region fallthrough
CT: control target
= control target key end

     0   :  { %12 = vsyncpa [#allocation3], 0  ;;  %s528_s0 = inlined_call_operand.vmem [shape: f32[8,32], index: 0, kind: input, shape index: {}]   ;;  %s529_s1 = inlined_call_operand.hbm [shape: bf16[32,128], index: 1, kind: input, shape index: {}]   ;;  %s530_s2 = inlined_call_operand.vmem [shape: f32[1,128], index: 2, kind: input, shape index: {}]   ;;  %s531_s3 = inlined_call_operand.vmem [shape: bf16[128,128], index: 3, kind: input, shape index: {}]   ;;  %s532_s4 = inlined_call_operand.vmem [shape: f32[1,128], index: 4, kind: input, shape index: {}]   ;;  %s533_s5 = inlined_call_operand.vmem [shape: bf16[128,16], index: 5, kind: input, shape index: {}]   ;;  %s534_s6 = inlined_call_operand.vmem [shape: f32[1,16], index: 6, kind: input, shape index: {}]   ;;  %s535_s7 = inlined_call_operand.hbm [shape: f32[8,16], index: 7, kind: output, shape index: {}]  }
   0x1   :  { %13 = vsyncpa [#allocation4], 0  ;;  %s20_s26 = sshll.u32 %s529_s1, 4  ;;  %s418_s27 = smov [#allocation2]   ;;  %s21_s26 = int_to_ptr.hbm [resolvable:$true] %s20_s26 }
   0x2   :  { %s22_s28 = sshll.u32 %s418_s27, 4  ;;  %s419_s29 = smov 64   ;;  %s23_s28 = int_to_ptr.vmem [resolvable:$true] %s22_s28 }
   0x3   :  { %s420_s30 = smov 4  }
   0x4   :  { %28 = dma.hbm_to_vmem [thread:$0]  %s21_s26, 256, %s23_s28, [#allocation3], %s419_s29, %s419_s29, %s420_s30  }
   0x5   :  { %414 = dma.done.wait [#allocation3], 256  }
   0x6   :  { %415 = vsyncadd [#allocation3], 4294967040  ;;  %v342_v0 = vld [vmem:[#allocation2 + $0x8] sm:$0xff]  ;;  %v350_v1 = vld [vmem:[%s531_s3 + $0x38] sm:$0xff]  ;;  %vm66_vm0 = vcmask 261120   ;;  %s421_s19 = smov [#allocation5]  }
   0x7   :  { %76 = vmatpush.bf16.msra.mxu0 %v342_v0  ;;  %v341_v2 = vld [vmem:[#allocation2] sm:$0xff]  ;;  %153 = vmatpush.bf16.msra.mxu1 %v350_v1  ;;  %v349_v4 = vld [vmem:[%s531_s3 + $0x30] sm:$0xff]  ;;  %v348_v6 = vld [vmem:[%s531_s3 + $0x28] sm:$0xff]  ;;  %s256_s20 = sshll.u32 %s421_s19, 4  ;;  %vm249_vm1 = vcmask 130048   ;;  %s257_s20 = int_to_ptr.vmem [resolvable:$true] %s256_s20 }
   0x8   :  { %v44_v3 = vld [vmem:[%s528_s0] sm:$0xff]  ;;  %v346_v8 = vld [vmem:[%s531_s3 + $0x18] sm:$0xff]  ;;  %v345_v9 = vld [vmem:[%s531_s3 + $0x10] sm:$0xff] }
   0x9   :  { %v45_v5 = vpack.c.bf16 %v44_v3, %v44_v3  ;;  %v347_v7 = vld [vmem:[%s531_s3 + $0x20] sm:$0xff]  ;;  %v344_v10 = vld [vmem:[%s531_s3 + $0x8] sm:$0xff]  ;;  %v358_v12 = vld [vmem:[%s533_s5 + $0x38] sm:$0xff] }
   0xa   :  { %v343_v11 = vld [vmem:[%s531_s3] sm:$0xff]  ;;  %236 = vmatpush.bf16.msra.mxu2 %v358_v12  ;;  %v357_v13 = vld [vmem:[%s533_s5 + $0x30] sm:$0xff]  ;;  %v356_v14 = vld [vmem:[%s533_s5 + $0x28] sm:$0xff] }
   0xb   :  { %77 = vmatpush.bf16.msra.mxu0 %v341_v2  ;;  %154 = vmatpush.bf16.msra.mxu1 %v349_v4  ;;  %v355_v15 = vld [vmem:[%s533_s5 + $0x20] sm:$0xff]  ;;  %v354_v16 = vld [vmem:[%s533_s5 + $0x18] sm:$0xff]  ;;  %v353_v17 = vld [vmem:[%s533_s5 + $0x10] sm:$0xff] }
   0xc   :  { %v363_v18 = vld [vmem:[%s530_s2] ss:$0 sm:$0xff]  ;;  %v352_v24 = vld [vmem:[%s533_s5 + $0x8] sm:$0xff] }
   0xd   :  { %v351_v25 = vld [vmem:[%s533_s5] sm:$0xff]  ;;  %s258_s5 = sshll.u32 %s535_s7, 4  ;;  %s259_s5 = int_to_ptr.hbm [resolvable:$true] %s258_s5 }
   0xe   :  { %276 = vmatmul.msk.bf16.vlgmr.msra.gmra.mxu0 %vm66_vm0, %v45_v5  ;;  %237 = vmatpush.bf16.msra.mxu2 %v357_v13  ;;  %v364_v26 = vld [vmem:[%s532_s4] ss:$0 sm:$0xff] }
   0xf   :  { %155 = vmatpush.bf16.msra.mxu1 %v348_v6  ;;  %v365_v32 = vld [vmem:[%s534_s6] ss:$0 sm:$0xff] }
  0x12   :  { %238 = vmatpush.bf16.msra.mxu2 %v356_v14 }
  0x13   :  { %156 = vmatpush.bf16.msra.mxu1 %v347_v7 }
  0x16   :  { %239 = vmatpush.bf16.msra.mxu2 %v355_v15 }
  0x17   :  { %157 = vmatpush.bf16.msra.mxu1 %v346_v8 }
  0x1a   :  { %240 = vmatpush.bf16.msra.mxu2 %v354_v16 }
  0x1b   :  { %158 = vmatpush.bf16.msra.mxu1 %v345_v9 }
  0x1e   :  { %241 = vmatpush.bf16.msra.mxu2 %v353_v17 }
  0x1f   :  { %159 = vmatpush.bf16.msra.mxu1 %v344_v10 }
  0x22   :  { %242 = vmatpush.bf16.msra.mxu2 %v352_v24 }
  0x23   :  { %160 = vmatpush.bf16.msra.mxu1 %v343_v11 }
  0x26   :  { %243 = vmatpush.bf16.msra.mxu2 %v351_v25 }
  0x8b   :  { %v79_v19 = vpop.f32.mrf.mxu0 }
  0x8c   :  { %v80_v20 = vadd.f32 %v363_v18, %v79_v19 }
  0x8e   :  { %v83_v21 = vmax.f32 %v80_v20, 0.0 }
  0x90   :  { %v84_v22 = vpack.c.bf16 %v83_v21, %v83_v21 }
  0x92   :  { %161 = vmatmul.bf16.vlgmr.msra.gmra.mxu1 %v84_v22 }
  0x93   :  { %v81_v23 = vpop.f32.mrf.mxu0 }
 0x10f   :  { %v162_v27 = vpop.f32.mrf.mxu1 }
 0x110   :  { %v163_v28 = vadd.f32 %v364_v26, %v162_v27 }
 0x112   :  { %v166_v29 = vmax.f32 %v163_v28, 0.0 }
 0x114   :  { %v167_v30 = vpack.c.bf16 %v166_v29, %v166_v29 }
 0x116   :  { %244 = vmatmul.bf16.vlgmr.msra.gmra.mxu2 %v167_v30 }
 0x117   :  { %v164_v31 = vpop.f32.mrf.mxu1 }
 0x199   :  { %v245_v33 = vpop.f32.mrf.mxu2 }
 0x19a   :  { %v246_v34 = vadd.f32 %v365_v32, %v245_v33 }
 0x19c   :  { %250 = vst.msk [vmem:[#allocation5] sm:$0xff] %vm249_vm1, %v246_v34 }
 0x19d   :  { %261 = dma.vmem_to_hbm [thread:$0]  %s257_s20, 128, %s259_s5, [#allocation4]  }
 0x1a1   :  { %v247_v35 = vpop.f32.mrf.mxu2 }
 0x1a2   :  { %416 = dma.done.wait [#allocation4], 128  }
 0x1a3   :  { %417 = vsyncadd [#allocation4], 4294967168 }
 0x1a4   :  { %266 = vsyncpa [#allocation3], 1 }
 0x1a5   :  { %267 = vsyncpa [#allocation4], 1 }

</bundles_post_ra>
